<compile_context>
chip_gen: v7x
topology: tpu7x:2x2x1
jax: 0.10.0
libtpu: 0.0.40
codegen_flags: <defaults>
</compile_context>

<pallas_src>
import numpy as np
import jax
import jax.numpy as jnp
from jax import lax
from jax.experimental import pallas as pl
from jax.experimental.pallas import tpu as pltpu

EPS = 1e-5  # PyTorch BatchNorm2d default


def _bn_lane(y, gamma, beta):
    """Training-mode BatchNorm on a lane-dense (rows, G*C) slab (lane = g*C + c).

    One-pass stats (sum / sum-of-squares, biased variance clamped at 0); the
    G spatial groups are folded with log2(G) lane-halving adds and the per-lane
    scale/shift is rebuilt with log2(G) doubling concats.  All math in f32.
    Note: one-pass E[x^2]-E[x]^2 is adequate for these activation ranges.
    """
    C = gamma.shape[1]
    GC = y.shape[1]
    G = GC // C
    n = y.shape[0] * G
    s = jnp.sum(y, axis=0, keepdims=True)            # (1, G*C)
    ss = jnp.sum(y * y, axis=0, keepdims=True)       # (1, G*C)
    st = jnp.concatenate([s, ss], axis=0)            # (2, G*C)
    if G & (G - 1) == 0:                             # log2(G) lane-halving fold
        w = GC
        while w > C:
            w //= 2
            st = st[:, :w] + st[:, w:2 * w]
    else:                                            # generic fallback
        acc = st[:, :C]
        for g in range(1, G):
            acc = acc + st[:, g * C:(g + 1) * C]
        st = acc
    inv_n = 1.0 / float(n)
    mean = st[0:1, :] * inv_n
    var = jnp.maximum(st[1:2, :] * inv_n - mean * mean, 0.0)
    scale = gamma * lax.rsqrt(var + EPS)             # (1, C)
    shift = beta - mean * scale                      # (1, C)
    z = jnp.concatenate([scale, shift], axis=0)      # (2, C)
    if G & (G - 1) == 0:                             # log2(G) lane doubling
        r = 1
        while r < G:
            z = jnp.concatenate([z, z], axis=1)
            r *= 2
    else:
        z = jnp.concatenate([z] * G, axis=1)
    return y * z[0:1, :] + z[1:2, :]


def _make_kernel(N, H, W, Cin, C1, C2):
    Ho, Wo = H // 2, W // 2
    NHo = N * Ho
    f32, bf16 = jnp.float32, jnp.bfloat16

    def kernel(x_ref, w1_ref, b2_ref, w3_ref, pidt_ref, bn_ref, mask_ref, out_ref):
        # ---- unpack the single BN gamma/beta row ----
        bn = bn_ref[...]
        off = [0]

        def take(c):
            v = bn[:, off[0]:off[0] + c]
            off[0] += c
            return v

        g1, b1 = take(C1), take(C1)
        g2, b2s = take(C1), take(C1)
        g3, b3 = take(C2), take(C2)
        gi, bi = take(C2), take(C2)

        # Even / odd input rows via stride-2 sublane loads (parity is
        # batch-consistent because H is even).  Reused by the conv path
        # (stride-2 row taps) and the AvgPool shortcut (row-pair sum).
        x_e = x_ref[pl.ds(0, NHo, stride=2), :]      # rows n*H + 2i
        x_o = x_ref[pl.ds(1, NHo, stride=2), :]      # rows n*H + 2i + 1

        # ---- conv1: 1x1 (block-diagonal weights) -> BN -> ReLU ----
        # Rows ordered [even; odd]; BN stats are order-invariant.
        xeo = jnp.concatenate([x_e, x_o], axis=0).astype(bf16)       # (N*H, W*Cin)
        h1 = jnp.dot(xeo, w1_ref[...], preferred_element_type=f32)   # (N*H, W*C1)
        h1 = jnp.maximum(_bn_lane(h1, g1, b1), 0.0)
        h1_e = h1[:NHo].astype(bf16)      # rows 2i     -> kh=1 tap
        h1_o = h1[NHo:].astype(bf16)      # rows 2i + 1 -> kh=2 tap (and kh=0 via shift)

        # ---- conv2: 3x3 / stride 2 / pad 1 as three accumulating MXU matmuls ----
        # kh=0 tap rows are 2i-1 = (rows 2i+1) shifted down one output row, so its
        # contribution is the kh=0 product rotated by one row and masked at the
        # top row of every batch image (zero padding).
        c0 = jnp.dot(h1_o, b2_ref[0], preferred_element_type=f32)    # (N*Ho, Wo*C1)
        h2 = pltpu.roll(c0, shift=1, axis=0) * mask_ref[...]
        h2 = h2 + jnp.dot(h1_e, b2_ref[1], preferred_element_type=f32)
        h2 = h2 + jnp.dot(h1_o, b2_ref[2], preferred_element_type=f32)
        h2 = jnp.maximum(_bn_lane(h2, g2, b2s), 0.0)

        # ---- conv3: 1x1 conv -> BN (no activation) ----
        h3 = jnp.dot(h2.astype(bf16), w3_ref[...], preferred_element_type=f32)
        h3 = _bn_lane(h3, g3, b3)                                    # (N*Ho, Wo*C2)

        # ---- shortcut: AvgPool2d(2,2) rows from the strided loads; column
        #      pooling and the 0.25 factor are folded into the 1x1 idt weights ----
        pooled = (x_e + x_o).astype(bf16)                            # (N*Ho, W*Cin)
        sc = jnp.dot(pooled, pidt_ref[...], preferred_element_type=f32)
        sc = _bn_lane(sc, gi, bi)                                    # (N*Ho, Wo*C2)

        # ---- residual add + ReLU, lane-dense (Wo*C2 = multiple of 128-ish) store ----
        out_ref[...] = jnp.maximum(h3 + sc, 0.0).astype(out_ref.dtype)

    return kernel


def prepare_resblock2(params, N, H, W):
    """One-time (hoisted out of the hot path) weight folding, in numpy."""
    assert H % 2 == 0 and W % 2 == 0, "stride-2 decomposition assumes even H, W"
    Ho, Wo = H // 2, W // 2
    p = {k: np.asarray(v, np.float32) for k, v in params.items()}
    Cin, C1 = p['w1'].shape
    C2 = p['w3'].shape[1]

    # block-diagonal 1x1-conv weights for the lane-dense (w, c) layout
    w1big = np.einsum('ab,io->aibo', np.eye(W, dtype=np.float32),
                      p['w1']).reshape(W * Cin, W * C1)
    w3big = np.einsum('ab,io->aibo', np.eye(Wo, dtype=np.float32),
                      p['w3']).reshape(Wo * C1, Wo * C2)

    # shortcut: AvgPool column pairs + 0.25 folded into the 1x1 idt conv
    j = np.arange(Wo)
    pool_w = np.eye(W, dtype=np.float32)[2 * j] + np.eye(W, dtype=np.float32)[2 * j + 1]
    p_idt = (0.25 * np.einsum('jw,io->wijo', pool_w, p['w_idt'])
             ).reshape(W * Cin, Wo * C2)

    # conv2 (3x3, stride 2, pad 1): per-kh weight blocks with the stride-2
    # column taps (and column zero-padding) folded in.
    w2 = p['w2'].reshape(3, 3, C1, C1)               # (kh, kw, cin, cout)
    b2stack = np.zeros((3, W * C1, Wo * C1), np.float32)
    for kh in range(3):
        bk = np.zeros((W, C1, Wo, C1), np.float32)
        for kw in range(3):
            c = 2 * j - 1 + kw
            valid = (c >= 0) & (c < W)
            sel = np.zeros((Wo, W), np.float32)
            sel[valid, c[valid]] = 1.0
            bk += np.einsum('jw,io->wijo', sel, w2[kh, kw])
        b2stack[kh] = bk.reshape(W * C1, Wo * C1)

    # BN gamma/beta packed into one lane-dense row: [g1,b1,g2,b2,g3,b3,gi,bi]
    flat = np.concatenate([p[k].reshape(-1) for k in
                           ('g1', 'b1', 'g2', 'b2', 'g3', 'b3', 'g_idt', 'b_idt')])
    L = ((flat.size + 127) // 128) * 128
    bn_pack = np.zeros((1, L), np.float32)
    bn_pack[0, :flat.size] = flat

    # boundary mask for the kh=0 (top zero-pad) row tap: 0 at i == 0 of each image
    mask0 = (np.arange(N * Ho) % Ho != 0).astype(np.float32).reshape(N * Ho, 1)

    bf16 = jnp.bfloat16
    return dict(w1big=jnp.asarray(w1big, bf16),
                b2stack=jnp.asarray(b2stack, bf16),
                w3big=jnp.asarray(w3big, bf16),
                p_idt=jnp.asarray(p_idt, bf16),
                bn=jnp.asarray(bn_pack),
                mask0=jnp.asarray(mask0))


@jax.jit
def resblock2_forward(x_nchw, prep):
    N, Cin, H, W = x_nchw.shape
    Ho, Wo = H // 2, W // 2
    C1 = prep['w1big'].shape[1] // W
    C2 = prep['p_idt'].shape[1] // Wo

    # lane-dense input slab: rows = (n, h), lanes = (w, cin)
    x2d = jnp.transpose(x_nchw, (0, 2, 3, 1)).reshape(N * H, W * Cin).astype(jnp.float32)

    kernel = _make_kernel(N, H, W, Cin, C1, C2)
    args = (x2d, prep['w1big'], prep['b2stack'], prep['w3big'],
            prep['p_idt'], prep['bn'], prep['mask0'])
    out2d = pl.pallas_call(
        kernel,
        out_shape=jax.ShapeDtypeStruct((N * Ho, Wo * C2), jnp.float32),
        in_specs=[pl.BlockSpec(memory_space=pltpu.MemorySpace.VMEM)] * len(args),
        out_specs=pl.BlockSpec(memory_space=pltpu.MemorySpace.VMEM),
    )(*args)

    out = out2d.reshape(N, Ho, Wo, C2)               # rows = (n, i), lanes = (j, c2)
    return jnp.transpose(out, (0, 3, 1, 2))          # back to NCHW


def init_params(key, in_c, c1, c2):
    # Matches ConvBlock.reset_parameters: kaiming_uniform (fan_in, relu gain) on
    # conv weights, BatchNorm gamma=1 / beta=0.  1x1 conv weights stored as
    # (Cin, Cout); the 3x3 conv as (9, Cin, Cout) = (kh*kw, Cin, Cout).
    ks = jax.random.split(key, 4)

    def kaiming_uniform(k, fan_in, shape):
        bound = float(np.sqrt(6.0 / fan_in))
        return jax.random.uniform(k, shape, jnp.float32, -bound, bound)

    return dict(
        w_idt=kaiming_uniform(ks[0], in_c, (in_c, c2)),
        w1=kaiming_uniform(ks[1], in_c, (in_c, c1)),
        w2=kaiming_uniform(ks[2], c1 * 9, (9, c1, c1)),
        w3=kaiming_uniform(ks[3], c1, (c1, c2)),
        g_idt=jnp.ones((1, c2), jnp.float32), b_idt=jnp.zeros((1, c2), jnp.float32),
        g1=jnp.ones((1, c1), jnp.float32), b1=jnp.zeros((1, c1), jnp.float32),
        g2=jnp.ones((1, c1), jnp.float32), b2=jnp.zeros((1, c1), jnp.float32),
        g3=jnp.ones((1, c2), jnp.float32), b3=jnp.zeros((1, c2), jnp.float32),
    )


def resblock2_reference(x_nchw, params):
    # Pure-JAX f32 reference of the module semantics (validation only).
    x = jnp.transpose(x_nchw, (0, 2, 3, 1)).astype(jnp.float32)

    def bn(y, g, b):
        mean = jnp.mean(y, axis=(0, 1, 2), keepdims=True)
        var = jnp.mean((y - mean) ** 2, axis=(0, 1, 2), keepdims=True)
        return (y - mean) * lax.rsqrt(var + EPS) * g.reshape(1, 1, 1, -1) + b.reshape(1, 1, 1, -1)

    def conv1x1(y, w):
        return jnp.einsum('nhwc,cd->nhwd', y, w, precision=lax.Precision.HIGHEST)

    pooled = lax.reduce_window(x, 0.0, lax.add, (1, 2, 2, 1), (1, 2, 2, 1), 'VALID') * 0.25
    sc = bn(conv1x1(pooled, params['w_idt']), params['g_idt'], params['b_idt'])
    h = jax.nn.relu(bn(conv1x1(x, params['w1']), params['g1'], params['b1']))
    c1 = params['w2'].shape[1]
    w2 = params['w2'].reshape(3, 3, c1, c1)  # HWIO
    h = lax.conv_general_dilated(h, w2, (2, 2), ((1, 1), (1, 1)),
                                 dimension_numbers=('NHWC', 'HWIO', 'NHWC'),
                                 precision=lax.Precision.HIGHEST)
    h = jax.nn.relu(bn(h, params['g2'], params['b2']))
    h = bn(conv1x1(h, params['w3']), params['g3'], params['b3'])
    out = jax.nn.relu(h + sc)
    return jnp.transpose(out, (0, 3, 1, 2))


if __name__ == "__main__":
    key = jax.random.PRNGKey(0)
    kx, kp = jax.random.split(key)
    N, in_c, c1, c2, H, W = 2, 4, 8, 16, 16, 16   # poolsize=2, stride=2, ks=3
    x = jax.random.normal(kx, (N, in_c, H, W), jnp.float32)
    params = init_params(kp, in_c, c1, c2)

    # one-time hoisted weight folding (not in the per-call path)
    prep = jax.tree_util.tree_map(jax.block_until_ready, prepare_resblock2(params, N, H, W))

    out = jax.block_until_ready(resblock2_forward(x, prep))
    ref = jax.block_until_ready(resblock2_reference(x, params))

    assert out.shape == (N, c2, H // 2, W // 2), out.shape
    # Tolerance accounts for bf16 MXU operands (f32 accumulation) vs the f32
    # HIGHEST-precision reference; structural bugs would produce O(1) errors.
    if not np.allclose(np.asarray(out), np.asarray(ref), atol=5e-2, rtol=5e-2):
        raise AssertionError("Pallas kernel mismatch vs JAX reference")
    print("KERNEL_OK")
</pallas_src>

<mosaic_0001>
module attributes {stable_mosaic.version = 11 : i64} {
  func.func @kernel(%arg0: memref<32x64xf32, #tpu.memory_space<vmem>>, %arg1: memref<64x128xbf16, #tpu.memory_space<vmem>>, %arg2: memref<3x128x64xbf16, #tpu.memory_space<vmem>>, %arg3: memref<64x128xbf16, #tpu.memory_space<vmem>>, %arg4: memref<64x128xbf16, #tpu.memory_space<vmem>>, %arg5: memref<1x128xf32, #tpu.memory_space<vmem>>, %arg6: memref<16x1xf32, #tpu.memory_space<vmem>>, %arg7: memref<16x128xf32, #tpu.memory_space<vmem>>) attributes {dimension_semantics = [], scalar_prefetch = 0 : i64, scratch_operands = 0 : i64, tpu.core_type = #tpu.core_type<tc>} {
    %c0 = arith.constant 0 : index
    %c0_0 = arith.constant 0 : index
    %0 = vector.load %arg5[%c0, %c0_0] : memref<1x128xf32, #tpu.memory_space<vmem>>, vector<1x128xf32>
    %1 = vector.extract_strided_slice %0 {offsets = [0, 0], sizes = [1, 8], strides = [1, 1]} : vector<1x128xf32> to vector<1x8xf32>
    %2 = vector.extract_strided_slice %0 {offsets = [0, 8], sizes = [1, 8], strides = [1, 1]} : vector<1x128xf32> to vector<1x8xf32>
    %3 = vector.extract_strided_slice %0 {offsets = [0, 16], sizes = [1, 8], strides = [1, 1]} : vector<1x128xf32> to vector<1x8xf32>
    %4 = vector.extract_strided_slice %0 {offsets = [0, 24], sizes = [1, 8], strides = [1, 1]} : vector<1x128xf32> to vector<1x8xf32>
    %5 = vector.extract_strided_slice %0 {offsets = [0, 32], sizes = [1, 16], strides = [1, 1]} : vector<1x128xf32> to vector<1x16xf32>
    %6 = vector.extract_strided_slice %0 {offsets = [0, 48], sizes = [1, 16], strides = [1, 1]} : vector<1x128xf32> to vector<1x16xf32>
    %7 = vector.extract_strided_slice %0 {offsets = [0, 64], sizes = [1, 16], strides = [1, 1]} : vector<1x128xf32> to vector<1x16xf32>
    %8 = vector.extract_strided_slice %0 {offsets = [0, 80], sizes = [1, 16], strides = [1, 1]} : vector<1x128xf32> to vector<1x16xf32>
    %c0_1 = arith.constant 0 : index
    %c0_2 = arith.constant 0 : index
    %9 = tpu.strided_load %arg0[%c0_1, %c0_2] {strides = array<i32: 2, 1>} : memref<32x64xf32, #tpu.memory_space<vmem>>, vector<16x64xf32>
    %c1 = arith.constant 1 : index
    %c0_3 = arith.constant 0 : index
    %10 = tpu.strided_load %arg0[%c1, %c0_3] {strides = array<i32: 2, 1>} : memref<32x64xf32, #tpu.memory_space<vmem>>, vector<16x64xf32>
    %11 = tpu.concatenate %9, %10 in 0 : vector<16x64xf32>, vector<16x64xf32> -> vector<32x64xf32>
    %12 = arith.truncf %11 : vector<32x64xf32> to vector<32x64xbf16>
    %c0_4 = arith.constant 0 : index
    %c0_5 = arith.constant 0 : index
    %13 = vector.load %arg1[%c0_4, %c0_5] : memref<64x128xbf16, #tpu.memory_space<vmem>>, vector<64x128xbf16>
    %cst = arith.constant dense<0.000000e+00> : vector<32x128xf32>
    %14 = tpu.matmul %12, %13, %cst {dimension_numbers = #tpu.dot_dimension_numbers<[1], [0], [0], [1], [0, 0, 1, 1], [], []>} : vector<32x64xbf16>, vector<64x128xbf16>, vector<32x128xf32> -> vector<32x128xf32>
    %cst_6 = arith.constant dense<0.000000e+00> : vector<128xf32>
    %15 = vector.multi_reduction <add>, %14, %cst_6 [0] : vector<32x128xf32> to vector<128xf32>
    %16 = vector.shape_cast %15 : vector<128xf32> to vector<1x128xf32>
    %17 = arith.mulf %14, %14 : vector<32x128xf32>
    %cst_7 = arith.constant dense<0.000000e+00> : vector<128xf32>
    %18 = vector.multi_reduction <add>, %17, %cst_7 [0] : vector<32x128xf32> to vector<128xf32>
    %19 = vector.shape_cast %18 : vector<128xf32> to vector<1x128xf32>
    %20 = tpu.concatenate %16, %19 in 0 : vector<1x128xf32>, vector<1x128xf32> -> vector<2x128xf32>
    %21 = vector.extract_strided_slice %20 {offsets = [0, 0], sizes = [2, 64], strides = [1, 1]} : vector<2x128xf32> to vector<2x64xf32>
    %22 = vector.extract_strided_slice %20 {offsets = [0, 64], sizes = [2, 64], strides = [1, 1]} : vector<2x128xf32> to vector<2x64xf32>
    %23 = arith.addf %21, %22 : vector<2x64xf32>
    %24 = vector.extract_strided_slice %23 {offsets = [0, 0], sizes = [2, 32], strides = [1, 1]} : vector<2x64xf32> to vector<2x32xf32>
    %25 = vector.extract_strided_slice %23 {offsets = [0, 32], sizes = [2, 32], strides = [1, 1]} : vector<2x64xf32> to vector<2x32xf32>
    %26 = arith.addf %24, %25 : vector<2x32xf32>
    %27 = vector.extract_strided_slice %26 {offsets = [0, 0], sizes = [2, 16], strides = [1, 1]} : vector<2x32xf32> to vector<2x16xf32>
    %28 = vector.extract_strided_slice %26 {offsets = [0, 16], sizes = [2, 16], strides = [1, 1]} : vector<2x32xf32> to vector<2x16xf32>
    %29 = arith.addf %27, %28 : vector<2x16xf32>
    %30 = vector.extract_strided_slice %29 {offsets = [0, 0], sizes = [2, 8], strides = [1, 1]} : vector<2x16xf32> to vector<2x8xf32>
    %31 = vector.extract_strided_slice %29 {offsets = [0, 8], sizes = [2, 8], strides = [1, 1]} : vector<2x16xf32> to vector<2x8xf32>
    %32 = arith.addf %30, %31 : vector<2x8xf32>
    %33 = vector.extract_strided_slice %32 {offsets = [0, 0], sizes = [1, 8], strides = [1, 1]} : vector<2x8xf32> to vector<1x8xf32>
    %cst_8 = arith.constant 0.001953125 : f32
    %34 = vector.broadcast %cst_8 : f32 to vector<1x8xf32>
    %35 = arith.mulf %33, %34 : vector<1x8xf32>
    %36 = vector.extract_strided_slice %32 {offsets = [1, 0], sizes = [1, 8], strides = [1, 1]} : vector<2x8xf32> to vector<1x8xf32>
    %cst_9 = arith.constant 0.001953125 : f32
    %37 = vector.broadcast %cst_9 : f32 to vector<1x8xf32>
    %38 = arith.mulf %36, %37 : vector<1x8xf32>
    %39 = arith.mulf %35, %35 : vector<1x8xf32>
    %40 = arith.subf %38, %39 : vector<1x8xf32>
    %cst_10 = arith.constant 0.000000e+00 : f32
    %41 = vector.broadcast %cst_10 : f32 to vector<1x8xf32>
    %42 = arith.maximumf %40, %41 : vector<1x8xf32>
    %cst_11 = arith.constant 9.99999974E-6 : f32
    %43 = vector.broadcast %cst_11 : f32 to vector<1x8xf32>
    %44 = arith.addf %42, %43 : vector<1x8xf32>
    %45 = math.rsqrt %44 : vector<1x8xf32>
    %46 = arith.mulf %1, %45 : vector<1x8xf32>
    %47 = arith.mulf %35, %46 : vector<1x8xf32>
    %48 = arith.subf %2, %47 : vector<1x8xf32>
    %49 = tpu.concatenate %46, %48 in 0 : vector<1x8xf32>, vector<1x8xf32> -> vector<2x8xf32>
    %50 = tpu.concatenate %49, %49 in 1 : vector<2x8xf32>, vector<2x8xf32> -> vector<2x16xf32>
    %51 = tpu.concatenate %50, %50 in 1 : vector<2x16xf32>, vector<2x16xf32> -> vector<2x32xf32>
    %52 = tpu.concatenate %51, %51 in 1 : vector<2x32xf32>, vector<2x32xf32> -> vector<2x64xf32>
    %53 = tpu.concatenate %52, %52 in 1 : vector<2x64xf32>, vector<2x64xf32> -> vector<2x128xf32>
    %54 = vector.extract_strided_slice %53 {offsets = [0, 0], sizes = [1, 128], strides = [1, 1]} : vector<2x128xf32> to vector<1x128xf32>
    %55 = vector.broadcast %54 : vector<1x128xf32> to vector<32x128xf32>
    %56 = arith.mulf %14, %55 : vector<32x128xf32>
    %57 = vector.extract_strided_slice %53 {offsets = [1, 0], sizes = [1, 128], strides = [1, 1]} : vector<2x128xf32> to vector<1x128xf32>
    %58 = vector.broadcast %57 : vector<1x128xf32> to vector<32x128xf32>
    %59 = arith.addf %56, %58 : vector<32x128xf32>
    %cst_12 = arith.constant 0.000000e+00 : f32
    %60 = vector.broadcast %cst_12 : f32 to vector<32x128xf32>
    %61 = arith.maximumf %59, %60 : vector<32x128xf32>
    %62 = vector.extract_strided_slice %61 {offsets = [0, 0], sizes = [16, 128], strides = [1, 1]} : vector<32x128xf32> to vector<16x128xf32>
    %63 = arith.truncf %62 : vector<16x128xf32> to vector<16x128xbf16>
    %64 = vector.extract_strided_slice %61 {offsets = [16, 0], sizes = [16, 128], strides = [1, 1]} : vector<32x128xf32> to vector<16x128xf32>
    %65 = arith.truncf %64 : vector<16x128xf32> to vector<16x128xbf16>
    %c0_13 = arith.constant 0 : index
    %c0_14 = arith.constant 0 : index
    %c0_15 = arith.constant 0 : index
    %66 = vector.load %arg2[%c0_13, %c0_14, %c0_15] : memref<3x128x64xbf16, #tpu.memory_space<vmem>>, vector<1x128x64xbf16>
    %67 = vector.shape_cast %66 : vector<1x128x64xbf16> to vector<128x64xbf16>
    %cst_16 = arith.constant dense<0.000000e+00> : vector<16x64xf32>
    %68 = tpu.matmul %65, %67, %cst_16 {dimension_numbers = #tpu.dot_dimension_numbers<[1], [0], [0], [1], [0, 0, 1, 1], [], []>} : vector<16x128xbf16>, vector<128x64xbf16>, vector<16x64xf32> -> vector<16x64xf32>
    %c1_i32 = arith.constant 1 : i32
    %69 = tpu.dynamic_rotate %68 by %c1_i32 dim 0 : vector<16x64xf32>, i32 -> vector<16x64xf32>
    %c0_17 = arith.constant 0 : index
    %c0_18 = arith.constant 0 : index
    %70 = vector.load %arg6[%c0_17, %c0_18] : memref<16x1xf32, #tpu.memory_space<vmem>>, vector<16x1xf32>
    %71 = vector.broadcast %70 : vector<16x1xf32> to vector<16x64xf32>
    %72 = arith.mulf %69, %71 : vector<16x64xf32>
    %c1_19 = arith.constant 1 : index
    %c0_20 = arith.constant 0 : index
    %c0_21 = arith.constant 0 : index
    %73 = vector.load %arg2[%c1_19, %c0_20, %c0_21] : memref<3x128x64xbf16, #tpu.memory_space<vmem>>, vector<1x128x64xbf16>
    %74 = vector.shape_cast %73 : vector<1x128x64xbf16> to vector<128x64xbf16>
    %cst_22 = arith.constant dense<0.000000e+00> : vector<16x64xf32>
    %75 = tpu.matmul %63, %74, %cst_22 {dimension_numbers = #tpu.dot_dimension_numbers<[1], [0], [0], [1], [0, 0, 1, 1], [], []>} : vector<16x128xbf16>, vector<128x64xbf16>, vector<16x64xf32> -> vector<16x64xf32>
    %76 = arith.addf %72, %75 : vector<16x64xf32>
    %c2 = arith.constant 2 : index
    %c0_23 = arith.constant 0 : index
    %c0_24 = arith.constant 0 : index
    %77 = vector.load %arg2[%c2, %c0_23, %c0_24] : memref<3x128x64xbf16, #tpu.memory_space<vmem>>, vector<1x128x64xbf16>
    %78 = vector.shape_cast %77 : vector<1x128x64xbf16> to vector<128x64xbf16>
    %cst_25 = arith.constant dense<0.000000e+00> : vector<16x64xf32>
    %79 = tpu.matmul %65, %78, %cst_25 {dimension_numbers = #tpu.dot_dimension_numbers<[1], [0], [0], [1], [0, 0, 1, 1], [], []>} : vector<16x128xbf16>, vector<128x64xbf16>, vector<16x64xf32> -> vector<16x64xf32>
    %80 = arith.addf %76, %79 : vector<16x64xf32>
    %cst_26 = arith.constant dense<0.000000e+00> : vector<64xf32>
    %81 = vector.multi_reduction <add>, %80, %cst_26 [0] : vector<16x64xf32> to vector<64xf32>
    %82 = vector.shape_cast %81 : vector<64xf32> to vector<1x64xf32>
    %83 = arith.mulf %80, %80 : vector<16x64xf32>
    %cst_27 = arith.constant dense<0.000000e+00> : vector<64xf32>
    %84 = vector.multi_reduction <add>, %83, %cst_27 [0] : vector<16x64xf32> to vector<64xf32>
    %85 = vector.shape_cast %84 : vector<64xf32> to vector<1x64xf32>
    %86 = tpu.concatenate %82, %85 in 0 : vector<1x64xf32>, vector<1x64xf32> -> vector<2x64xf32>
    %87 = vector.extract_strided_slice %86 {offsets = [0, 0], sizes = [2, 32], strides = [1, 1]} : vector<2x64xf32> to vector<2x32xf32>
    %88 = vector.extract_strided_slice %86 {offsets = [0, 32], sizes = [2, 32], strides = [1, 1]} : vector<2x64xf32> to vector<2x32xf32>
    %89 = arith.addf %87, %88 : vector<2x32xf32>
    %90 = vector.extract_strided_slice %89 {offsets = [0, 0], sizes = [2, 16], strides = [1, 1]} : vector<2x32xf32> to vector<2x16xf32>
    %91 = vector.extract_strided_slice %89 {offsets = [0, 16], sizes = [2, 16], strides = [1, 1]} : vector<2x32xf32> to vector<2x16xf32>
    %92 = arith.addf %90, %91 : vector<2x16xf32>
    %93 = vector.extract_strided_slice %92 {offsets = [0, 0], sizes = [2, 8], strides = [1, 1]} : vector<2x16xf32> to vector<2x8xf32>
    %94 = vector.extract_strided_slice %92 {offsets = [0, 8], sizes = [2, 8], strides = [1, 1]} : vector<2x16xf32> to vector<2x8xf32>
    %95 = arith.addf %93, %94 : vector<2x8xf32>
    %96 = vector.extract_strided_slice %95 {offsets = [0, 0], sizes = [1, 8], strides = [1, 1]} : vector<2x8xf32> to vector<1x8xf32>
    %cst_28 = arith.constant 7.812500e-03 : f32
    %97 = vector.broadcast %cst_28 : f32 to vector<1x8xf32>
    %98 = arith.mulf %96, %97 : vector<1x8xf32>
    %99 = vector.extract_strided_slice %95 {offsets = [1, 0], sizes = [1, 8], strides = [1, 1]} : vector<2x8xf32> to vector<1x8xf32>
    %cst_29 = arith.constant 7.812500e-03 : f32
    %100 = vector.broadcast %cst_29 : f32 to vector<1x8xf32>
    %101 = arith.mulf %99, %100 : vector<1x8xf32>
    %102 = arith.mulf %98, %98 : vector<1x8xf32>
    %103 = arith.subf %101, %102 : vector<1x8xf32>
    %cst_30 = arith.constant 0.000000e+00 : f32
    %104 = vector.broadcast %cst_30 : f32 to vector<1x8xf32>
    %105 = arith.maximumf %103, %104 : vector<1x8xf32>
    %cst_31 = arith.constant 9.99999974E-6 : f32
    %106 = vector.broadcast %cst_31 : f32 to vector<1x8xf32>
    %107 = arith.addf %105, %106 : vector<1x8xf32>
    %108 = math.rsqrt %107 : vector<1x8xf32>
    %109 = arith.mulf %3, %108 : vector<1x8xf32>
    %110 = arith.mulf %98, %109 : vector<1x8xf32>
    %111 = arith.subf %4, %110 : vector<1x8xf32>
    %112 = tpu.concatenate %109, %111 in 0 : vector<1x8xf32>, vector<1x8xf32> -> vector<2x8xf32>
    %113 = tpu.concatenate %112, %112 in 1 : vector<2x8xf32>, vector<2x8xf32> -> vector<2x16xf32>
    %114 = tpu.concatenate %113, %113 in 1 : vector<2x16xf32>, vector<2x16xf32> -> vector<2x32xf32>
    %115 = tpu.concatenate %114, %114 in 1 : vector<2x32xf32>, vector<2x32xf32> -> vector<2x64xf32>
    %116 = vector.extract_strided_slice %115 {offsets = [0, 0], sizes = [1, 64], strides = [1, 1]} : vector<2x64xf32> to vector<1x64xf32>
    %117 = vector.broadcast %116 : vector<1x64xf32> to vector<16x64xf32>
    %118 = arith.mulf %80, %117 : vector<16x64xf32>
    %119 = vector.extract_strided_slice %115 {offsets = [1, 0], sizes = [1, 64], strides = [1, 1]} : vector<2x64xf32> to vector<1x64xf32>
    %120 = vector.broadcast %119 : vector<1x64xf32> to vector<16x64xf32>
    %121 = arith.addf %118, %120 : vector<16x64xf32>
    %cst_32 = arith.constant 0.000000e+00 : f32
    %122 = vector.broadcast %cst_32 : f32 to vector<16x64xf32>
    %123 = arith.maximumf %121, %122 : vector<16x64xf32>
    %124 = arith.truncf %123 : vector<16x64xf32> to vector<16x64xbf16>
    %c0_33 = arith.constant 0 : index
    %c0_34 = arith.constant 0 : index
    %125 = vector.load %arg3[%c0_33, %c0_34] : memref<64x128xbf16, #tpu.memory_space<vmem>>, vector<64x128xbf16>
    %cst_35 = arith.constant dense<0.000000e+00> : vector<16x128xf32>
    %126 = tpu.matmul %124, %125, %cst_35 {dimension_numbers = #tpu.dot_dimension_numbers<[1], [0], [0], [1], [0, 0, 1, 1], [], []>} : vector<16x64xbf16>, vector<64x128xbf16>, vector<16x128xf32> -> vector<16x128xf32>
    %cst_36 = arith.constant dense<0.000000e+00> : vector<128xf32>
    %127 = vector.multi_reduction <add>, %126, %cst_36 [0] : vector<16x128xf32> to vector<128xf32>
    %128 = vector.shape_cast %127 : vector<128xf32> to vector<1x128xf32>
    %129 = arith.mulf %126, %126 : vector<16x128xf32>
    %cst_37 = arith.constant dense<0.000000e+00> : vector<128xf32>
    %130 = vector.multi_reduction <add>, %129, %cst_37 [0] : vector<16x128xf32> to vector<128xf32>
    %131 = vector.shape_cast %130 : vector<128xf32> to vector<1x128xf32>
    %132 = tpu.concatenate %128, %131 in 0 : vector<1x128xf32>, vector<1x128xf32> -> vector<2x128xf32>
    %133 = vector.extract_strided_slice %132 {offsets = [0, 0], sizes = [2, 64], strides = [1, 1]} : vector<2x128xf32> to vector<2x64xf32>
    %134 = vector.extract_strided_slice %132 {offsets = [0, 64], sizes = [2, 64], strides = [1, 1]} : vector<2x128xf32> to vector<2x64xf32>
    %135 = arith.addf %133, %134 : vector<2x64xf32>
    %136 = vector.extract_strided_slice %135 {offsets = [0, 0], sizes = [2, 32], strides = [1, 1]} : vector<2x64xf32> to vector<2x32xf32>
    %137 = vector.extract_strided_slice %135 {offsets = [0, 32], sizes = [2, 32], strides = [1, 1]} : vector<2x64xf32> to vector<2x32xf32>
    %138 = arith.addf %136, %137 : vector<2x32xf32>
    %139 = vector.extract_strided_slice %138 {offsets = [0, 0], sizes = [2, 16], strides = [1, 1]} : vector<2x32xf32> to vector<2x16xf32>
    %140 = vector.extract_strided_slice %138 {offsets = [0, 16], sizes = [2, 16], strides = [1, 1]} : vector<2x32xf32> to vector<2x16xf32>
    %141 = arith.addf %139, %140 : vector<2x16xf32>
    %142 = vector.extract_strided_slice %141 {offsets = [0, 0], sizes = [1, 16], strides = [1, 1]} : vector<2x16xf32> to vector<1x16xf32>
    %cst_38 = arith.constant 7.812500e-03 : f32
    %143 = vector.broadcast %cst_38 : f32 to vector<1x16xf32>
    %144 = arith.mulf %142, %143 : vector<1x16xf32>
    %145 = vector.extract_strided_slice %141 {offsets = [1, 0], sizes = [1, 16], strides = [1, 1]} : vector<2x16xf32> to vector<1x16xf32>
    %cst_39 = arith.constant 7.812500e-03 : f32
    %146 = vector.broadcast %cst_39 : f32 to vector<1x16xf32>
    %147 = arith.mulf %145, %146 : vector<1x16xf32>
    %148 = arith.mulf %144, %144 : vector<1x16xf32>
    %149 = arith.subf %147, %148 : vector<1x16xf32>
    %cst_40 = arith.constant 0.000000e+00 : f32
    %150 = vector.broadcast %cst_40 : f32 to vector<1x16xf32>
    %151 = arith.maximumf %149, %150 : vector<1x16xf32>
    %cst_41 = arith.constant 9.99999974E-6 : f32
    %152 = vector.broadcast %cst_41 : f32 to vector<1x16xf32>
    %153 = arith.addf %151, %152 : vector<1x16xf32>
    %154 = math.rsqrt %153 : vector<1x16xf32>
    %155 = arith.mulf %5, %154 : vector<1x16xf32>
    %156 = arith.mulf %144, %155 : vector<1x16xf32>
    %157 = arith.subf %6, %156 : vector<1x16xf32>
    %158 = tpu.concatenate %155, %157 in 0 : vector<1x16xf32>, vector<1x16xf32> -> vector<2x16xf32>
    %159 = tpu.concatenate %158, %158 in 1 : vector<2x16xf32>, vector<2x16xf32> -> vector<2x32xf32>
    %160 = tpu.concatenate %159, %159 in 1 : vector<2x32xf32>, vector<2x32xf32> -> vector<2x64xf32>
    %161 = tpu.concatenate %160, %160 in 1 : vector<2x64xf32>, vector<2x64xf32> -> vector<2x128xf32>
    %162 = vector.extract_strided_slice %161 {offsets = [0, 0], sizes = [1, 128], strides = [1, 1]} : vector<2x128xf32> to vector<1x128xf32>
    %163 = vector.broadcast %162 : vector<1x128xf32> to vector<16x128xf32>
    %164 = arith.mulf %126, %163 : vector<16x128xf32>
    %165 = vector.extract_strided_slice %161 {offsets = [1, 0], sizes = [1, 128], strides = [1, 1]} : vector<2x128xf32> to vector<1x128xf32>
    %166 = vector.broadcast %165 : vector<1x128xf32> to vector<16x128xf32>
    %167 = arith.addf %164, %166 : vector<16x128xf32>
    %168 = arith.addf %9, %10 : vector<16x64xf32>
    %169 = arith.truncf %168 : vector<16x64xf32> to vector<16x64xbf16>
    %c0_42 = arith.constant 0 : index
    %c0_43 = arith.constant 0 : index
    %170 = vector.load %arg4[%c0_42, %c0_43] : memref<64x128xbf16, #tpu.memory_space<vmem>>, vector<64x128xbf16>
    %cst_44 = arith.constant dense<0.000000e+00> : vector<16x128xf32>
    %171 = tpu.matmul %169, %170, %cst_44 {dimension_numbers = #tpu.dot_dimension_numbers<[1], [0], [0], [1], [0, 0, 1, 1], [], []>} : vector<16x64xbf16>, vector<64x128xbf16>, vector<16x128xf32> -> vector<16x128xf32>
    %cst_45 = arith.constant dense<0.000000e+00> : vector<128xf32>
    %172 = vector.multi_reduction <add>, %171, %cst_45 [0] : vector<16x128xf32> to vector<128xf32>
    %173 = vector.shape_cast %172 : vector<128xf32> to vector<1x128xf32>
    %174 = arith.mulf %171, %171 : vector<16x128xf32>
    %cst_46 = arith.constant dense<0.000000e+00> : vector<128xf32>
    %175 = vector.multi_reduction <add>, %174, %cst_46 [0] : vector<16x128xf32> to vector<128xf32>
    %176 = vector.shape_cast %175 : vector<128xf32> to vector<1x128xf32>
    %177 = tpu.concatenate %173, %176 in 0 : vector<1x128xf32>, vector<1x128xf32> -> vector<2x128xf32>
    %178 = vector.extract_strided_slice %177 {offsets = [0, 0], sizes = [2, 64], strides = [1, 1]} : vector<2x128xf32> to vector<2x64xf32>
    %179 = vector.extract_strided_slice %177 {offsets = [0, 64], sizes = [2, 64], strides = [1, 1]} : vector<2x128xf32> to vector<2x64xf32>
    %180 = arith.addf %178, %179 : vector<2x64xf32>
    %181 = vector.extract_strided_slice %180 {offsets = [0, 0], sizes = [2, 32], strides = [1, 1]} : vector<2x64xf32> to vector<2x32xf32>
    %182 = vector.extract_strided_slice %180 {offsets = [0, 32], sizes = [2, 32], strides = [1, 1]} : vector<2x64xf32> to vector<2x32xf32>
    %183 = arith.addf %181, %182 : vector<2x32xf32>
    %184 = vector.extract_strided_slice %183 {offsets = [0, 0], sizes = [2, 16], strides = [1, 1]} : vector<2x32xf32> to vector<2x16xf32>
    %185 = vector.extract_strided_slice %183 {offsets = [0, 16], sizes = [2, 16], strides = [1, 1]} : vector<2x32xf32> to vector<2x16xf32>
    %186 = arith.addf %184, %185 : vector<2x16xf32>
    %187 = vector.extract_strided_slice %186 {offsets = [0, 0], sizes = [1, 16], strides = [1, 1]} : vector<2x16xf32> to vector<1x16xf32>
    %cst_47 = arith.constant 7.812500e-03 : f32
    %188 = vector.broadcast %cst_47 : f32 to vector<1x16xf32>
    %189 = arith.mulf %187, %188 : vector<1x16xf32>
    %190 = vector.extract_strided_slice %186 {offsets = [1, 0], sizes = [1, 16], strides = [1, 1]} : vector<2x16xf32> to vector<1x16xf32>
    %cst_48 = arith.constant 7.812500e-03 : f32
    %191 = vector.broadcast %cst_48 : f32 to vector<1x16xf32>
    %192 = arith.mulf %190, %191 : vector<1x16xf32>
    %193 = arith.mulf %189, %189 : vector<1x16xf32>
    %194 = arith.subf %192, %193 : vector<1x16xf32>
    %cst_49 = arith.constant 0.000000e+00 : f32
    %195 = vector.broadcast %cst_49 : f32 to vector<1x16xf32>
    %196 = arith.maximumf %194, %195 : vector<1x16xf32>
    %cst_50 = arith.constant 9.99999974E-6 : f32
    %197 = vector.broadcast %cst_50 : f32 to vector<1x16xf32>
    %198 = arith.addf %196, %197 : vector<1x16xf32>
    %199 = math.rsqrt %198 : vector<1x16xf32>
    %200 = arith.mulf %7, %199 : vector<1x16xf32>
    %201 = arith.mulf %189, %200 : vector<1x16xf32>
    %202 = arith.subf %8, %201 : vector<1x16xf32>
    %203 = tpu.concatenate %200, %202 in 0 : vector<1x16xf32>, vector<1x16xf32> -> vector<2x16xf32>
    %204 = tpu.concatenate %203, %203 in 1 : vector<2x16xf32>, vector<2x16xf32> -> vector<2x32xf32>
    %205 = tpu.concatenate %204, %204 in 1 : vector<2x32xf32>, vector<2x32xf32> -> vector<2x64xf32>
    %206 = tpu.concatenate %205, %205 in 1 : vector<2x64xf32>, vector<2x64xf32> -> vector<2x128xf32>
    %207 = vector.extract_strided_slice %206 {offsets = [0, 0], sizes = [1, 128], strides = [1, 1]} : vector<2x128xf32> to vector<1x128xf32>
    %208 = vector.broadcast %207 : vector<1x128xf32> to vector<16x128xf32>
    %209 = arith.mulf %171, %208 : vector<16x128xf32>
    %210 = vector.extract_strided_slice %206 {offsets = [1, 0], sizes = [1, 128], strides = [1, 1]} : vector<2x128xf32> to vector<1x128xf32>
    %211 = vector.broadcast %210 : vector<1x128xf32> to vector<16x128xf32>
    %212 = arith.addf %209, %211 : vector<16x128xf32>
    %213 = arith.addf %167, %212 : vector<16x128xf32>
    %cst_51 = arith.constant 0.000000e+00 : f32
    %214 = vector.broadcast %cst_51 : f32 to vector<16x128xf32>
    %215 = arith.maximumf %213, %214 : vector<16x128xf32>
    %c0_52 = arith.constant 0 : index
    %c0_53 = arith.constant 0 : index
    %216 = vector.load %arg7[%c0_52, %c0_53] : memref<16x128xf32, #tpu.memory_space<vmem>>, vector<16x128xf32>
    tpu.vector_store %arg7[%c0_52, %c0_53], %215 {strides = array<i32>} : memref<16x128xf32, #tpu.memory_space<vmem>>, vector<16x128xf32>,
    return
  }
}

</mosaic_0001>

<bundles_post_ra>
// kernel: resblock2_forward.1
= control target key start
LH: loop header
LB: loop body
LE: loop exit
PB: predicated region body
PF: predicated region fallthrough
CT: control target
= control target key end

     0   :  { %vm69_vm0 = vcmask 523264   ;;  %vm147_vm1 = vcmask 1040384   ;;  %s1450_s17 = smov 112   ;;  %s1451_s18 = smov 120   ;;  %v1452_v54 = vmov 1966171168   ;;  %v182_v56 = vlaneseq  ;;  %s1867_s1 = inlined_call_operand.vmem [shape: bf16[64,128], index: 1, kind: input, shape index: {}]   ;;  %s1868_s0 = inlined_call_operand.vmem [shape: f32[32,64], index: 0, kind: input, shape index: {}]   ;;  %s1869_s5 = inlined_call_operand.vmem [shape: f32[1,128], index: 5, kind: input, shape index: {}]   ;;  %s1870_s2 = inlined_call_operand.vmem [shape: bf16[3,128,64], index: 2, kind: input, shape index: {}]   ;;  %s1871_s6 = inlined_call_operand.vmem [shape: f32[16,1], index: 6, kind: input, shape index: {}]   ;;  %s1872_s3 = inlined_call_operand.vmem [shape: bf16[64,128], index: 3, kind: input, shape index: {}]   ;;  %s1873_s4 = inlined_call_operand.vmem [shape: bf16[64,128], index: 4, kind: input, shape index: {}]   ;;  %s1874_s7 = inlined_call_operand.vmem [shape: f32[16,128], index: 7, kind: output, shape index: {}]  }
   0x1   :  { %v1404_v0 = vld [vmem:[%s1867_s1] sm:$0xff]   ;;  %v1405_v1 = vld [vmem:[%s1867_s1 + $0x8] sm:$0xff]   ;;  %v1406_v2 = vld [vmem:[%s1867_s1 + $0x10] sm:$0xff]   ;;  %v180_v55 = vunpack.c.l.s4 %v1452_v54  ;;  %s1453_s21 = smov 8   ;;  %vm229_vm2 = vcmask 64512   ;;  %vm235_vm3 = vcmask 130048  }
   0x2   :  { %1286 = vmatprep.subr.bf16.mxu0 %v1404_v0  ;;  %v28_v3 = vld [vmem:[%s1868_s0] ss:$2 sm:$0xff]  ;;  %v1168_v4 = vld [vmem:[%s1868_s0 + $0x10] ss:$2 sm:$0xff]  ;;  %v1169_v5 = vld [vmem:[%s1868_s0 + $0x1] ss:$2 sm:$0xff] }
   0x3   :  { %1287 = vmatpush3.bf16.msra.mxu0 %v1404_v0  ;;  %v1170_v6 = vld [vmem:[%s1868_s0 + $0x11] ss:$2 sm:$0xff]  ;;  %v35_v7 = vpack.c.bf16 %v1168_v4, %v28_v3  ;;  %v1523_v8 = vadd.f32 %v1169_v5, %v28_v3  ;;  %s1448_s0 = smov 64   ;;  %v181_v57 = vunpack.c.0.s8 %v180_v55  ;;  %v1559_v58 = vshrl.u32 %v182_v56, 7  ;;  %v1568_v63 = vld [vmem:[%s1869_s5] sm:$0x1] }
   0x4   :  { %1288 = vmatprep.subr.bf16.mxu0 %v1405_v1  ;;  %v1525_v9 = vadd.f32 %v1170_v6, %v1168_v4  ;;  %v1407_v10 = vld [vmem:[%s1867_s1 + $0x18] sm:$0xff]   ;;  %v36_v12 = vpack.c.bf16 %v1170_v6, %v1169_v5  ;;  %s1449_s1 = smov 96   ;;  %s1454_s5 = smov 16   ;;  %vm1457_vm4 = vmmov 0   ;;  %vm241_vm5 = vcmask 261120  }
   0x5   :  { %1294 = vmatprep.mubr.msk.bf16.mxu0 %vm69_vm0, %v35_v7  ;;  %v1562_v59 = vsub.s32 %v181_v57, %v1559_v58  ;;  %v1575_v5 = vsub.s32 0, %v1559_v58  ;;  %s1456_s15 = smov 32   ;;  %vm379_vm6 = vcmp.lt.s32.totalorder %v1559_v58, 1  ;;  %s1461_s25 = smov 80  }
   0x6   :  { %v953_v11 = vpack.c.bf16 %v1525_v9, %v1523_v8 }
   0x7   :  { %1289 = vmatpush3.bf16.msra.mxu0 %v1405_v1 }
   0x8   :  { %1290 = vmatprep.subr.bf16.mxu0 %v1406_v2 }
   0xb   :  { %1291 = vmatpush3.bf16.msra.mxu0 %v1406_v2 }
   0xc   :  { %1292 = vmatprep.subr.bf16.mxu0 %v1407_v10 }
   0xf   :  { %1293 = vmatpush3.bf16.msra.mxu0 %v1407_v10 }
  0x12   :  { %1295 = vmatmul.mubr.msk.bf16.vlgmr.msra.gmra.mrb[0].mxu0 %vm69_vm0, %v36_v12 }
  0xe5   :  { %v1534_v13 = vpop.f32.mrb[0].mxu0 }
  0xe6   :  { %v1536_v14 = vpop.f32.mrb[1].mxu0  ;;  %v136_v20 = vmul.f32 %v1534_v13, %v1534_v13 }
  0xe7   :  { %v1538_v15 = vpop.f32.mrb[2].mxu0  ;;  %v134_v17 = vmul.f32 %v1536_v14, %v1536_v14 }
  0xe8   :  { %v1540_v16 = vpop.f32.mrb[3].mxu0  ;;  %v137_v23 = vmul.f32 %v1538_v15, %v1538_v15 }
  0xe9   :  { %v125_v18 = vadd.f32 %v1540_v16, %v1536_v14  ;;  %v135_v19 = vmul.f32 %v1540_v16, %v1540_v16 }
  0xeb   :  { %v126_v21 = vadd.f32 %v1534_v13, %v125_v18  ;;  %v138_v22 = vadd.f32 %v135_v19, %v134_v17 }
  0xed   :  { %v127_v24 = vadd.f32 %v1538_v15, %v126_v21  ;;  %v139_v25 = vadd.f32 %v138_v22, %v136_v20  ;;  %v1455_v20 = vmov 0.0   ;;  %v1408_v21 = vld [vmem:[%s1870_s2 + $0x40] sm:$0xff]  }
  0xee   :  { %1318 = vmatprep.subr.bf16.mxu0 %v1455_v20  ;;  %1298 = vmatprep.subr.bf16.mxu1 %v1455_v20  ;;  %v1409_v22 = vld [vmem:[%s1870_s2] sm:$0xff]  }
  0xef   :  { %v128_v26 = vrot.slane %v127_v24, 4  ;;  %v140_v27 = vadd.f32 %v139_v25, %v137_v23  ;;  %1319 = vmatpush3.bf16.msra.mxu0 %v1408_v21  ;;  %v1410_v23 = vld [vmem:[%s1870_s2 + $0x48] sm:$0xff]   ;;  %1299 = vmatpush3.bf16.msra.mxu1 %v1409_v22  ;;  %v1412_v25 = vld [vmem:[%s1870_s2 + $0x50] sm:$0xff]  }
  0xf0   :  { %1320 = vmatprep.subr.bf16.mxu0 %v1455_v20  ;;  %1300 = vmatprep.subr.bf16.mxu1 %v1455_v20 }
  0xf1   :  { %v129_v28 = vadd.f32 %v128_v26, %v127_v24  ;;  %v141_v29 = vrot.slane %v140_v27, 4  ;;  %v1411_v24 = vld [vmem:[%s1870_s2 + $0x8] sm:$0xff]   ;;  %v1413_v26 = vld [vmem:[%s1870_s2 + $0x10] sm:$0xff]   ;;  %1314 = vmatprep.mubr.msk.bf16.mxu1 %vm1457_vm4, %v1455_v20  ;;  %1334 = vmatprep.mubr.msk.bf16.mxu0 %vm1457_vm4, %v1455_v20 }
  0xf3   :  { %v130_v30 = vrot.slane %v129_v28, 2  ;;  %v142_v31 = vadd.f32 %v141_v29, %v140_v27  ;;  %1321 = vmatpush3.bf16.msra.mxu0 %v1410_v23  ;;  %1301 = vmatpush3.bf16.msra.mxu1 %v1411_v24 }
  0xf4   :  { %1322 = vmatprep.subr.bf16.mxu0 %v1455_v20  ;;  %1302 = vmatprep.subr.bf16.mxu1 %v1455_v20 }
  0xf5   :  { %v131_v32 = vadd.f32 %v130_v30, %v129_v28  ;;  %v143_v33 = vrot.slane %v142_v31, 2  ;;  %v1414_v28 = vld [vmem:[%s1870_s2 + $0x58] sm:$0xff]  }
  0xf6   :  { %v1415_v30 = vld [vmem:[%s1870_s2 + $0x18] sm:$0xff]  }
  0xf7   :  { %v132_v34 = vrot.slane %v131_v32, 1  ;;  %v144_v35 = vadd.f32 %v143_v33, %v142_v31  ;;  %1323 = vmatpush3.bf16.msra.mxu0 %v1412_v25  ;;  %1303 = vmatpush3.bf16.msra.mxu1 %v1413_v26  ;;  %v1416_v31 = vld [vmem:[%s1870_s2 + $0x60] sm:$0xff]   ;;  %v1418_v33 = vld [vmem:[%s1870_s2 + $0x68] sm:$0xff]  }
  0xf8   :  { %1324 = vmatprep.subr.bf16.mxu0 %v1455_v20  ;;  %1304 = vmatprep.subr.bf16.mxu1 %v1455_v20 }
  0xf9   :  { %v145_v36 = vrot.slane %v144_v35, 1  ;;  %v133_v37 = vadd.f32 %v132_v34, %v131_v32  ;;  %v1417_v32 = vld [vmem:[%s1870_s2 + $0x20] sm:$0xff]   ;;  %v1419_v34 = vld [vmem:[%s1870_s2 + $0x28] sm:$0xff]  }
  0xfb   :  { %v146_v38 = vadd.f32 %v145_v36, %v144_v35  ;;  %1325 = vmatpush3.bf16.msra.mxu0 %v1414_v28  ;;  %1305 = vmatpush3.bf16.msra.mxu1 %v1415_v30  ;;  %v1420_v35 = vld [vmem:[%s1870_s2 + $0x70] sm:$0xff]  }
  0xfc   :  { %1326 = vmatprep.subr.bf16.mxu0 %v1455_v20  ;;  %1306 = vmatprep.subr.bf16.mxu1 %v1455_v20  ;;  %v1421_v36 = vld [vmem:[%s1870_s2 + $0x30] sm:$0xff]  }
  0xfd   :  { %v148_v39 = vsel %vm147_vm1, %v133_v37, %v146_v38  ;;  %v1422_v37 = vld [vmem:[%s1870_s2 + $0x78] sm:$0xff]  }
  0xfe   :  { %150 = vrot.lane.b32.xlu0 %v148_v39, %s1448_s0  ;;  %v1423_v38 = vld [vmem:[%s1870_s2 + $0x38] sm:$0xff]  }
  0xff   :  { %1327 = vmatpush3.bf16.msra.mxu0 %v1416_v31  ;;  %1307 = vmatpush3.bf16.msra.mxu1 %v1417_v32 }
 0x100   :  { %1328 = vmatprep.subr.bf16.mxu0 %v1455_v20  ;;  %1308 = vmatprep.subr.bf16.mxu1 %v1455_v20 }
 0x103   :  { %1329 = vmatpush3.bf16.msra.mxu0 %v1418_v33  ;;  %1309 = vmatpush3.bf16.msra.mxu1 %v1419_v34 }
 0x104   :  { %1330 = vmatprep.subr.bf16.mxu0 %v1455_v20  ;;  %1310 = vmatprep.subr.bf16.mxu1 %v1455_v20 }
 0x107   :  { %1331 = vmatpush3.bf16.msra.mxu0 %v1420_v35  ;;  %1311 = vmatpush3.bf16.msra.mxu1 %v1421_v36 }
 0x108   :  { %1332 = vmatprep.subr.bf16.mxu0 %v1455_v20  ;;  %1312 = vmatprep.subr.bf16.mxu1 %v1455_v20 }
 0x10b   :  { %1333 = vmatpush3.bf16.msra.mxu0 %v1422_v37  ;;  %1313 = vmatpush3.bf16.msra.mxu1 %v1423_v38 }
 0x10c   :  { %1338 = vmatprep.subr.bf16.mxu0 %v1455_v20  ;;  %1358 = vmatprep.subr.bf16.mxu1 %v1455_v20 }
 0x170   :  { %v151_v40 = vpop.permute.xlu0 %150 }
 0x171   :  { %v153_v41 = vadd.f32 %v151_v40, %v148_v39 }
 0x173   :  { %155 = vrot.lane.b32.xlu0 %v153_v41, %s1449_s1 }
 0x1e5   :  { %v156_v42 = vpop.permute.xlu0 %155 }
 0x1e6   :  { %v158_v43 = vadd.f32 %v156_v42, %v153_v41  ;;  %v1458_v41 = vmov 0   ;;  %v382_v42 = vld [vmem:[%s1871_s6] sm:$0xff] }
 0x1e7   :  { %1403 = vset.pattern.permute.xlu1 %v1458_v41  ;;  %1402 = vset.pattern.permute.xlu0 %v1458_v41 }
 0x1e8   :  { %160 = vrot.lane.b32.xlu1 %v158_v43, %s1450_s17 }
 0x25a   :  { %v161_v44 = vpop.permute.xlu1 %160 }
 0x25b   :  { %v163_v45 = vadd.f32 %v161_v44, %v158_v43  ;;  %v383_v43 = vld [vmem:[%s1871_s6 + $0x8] sm:$0xff]  ;;  %v1664_v44 = vsub.s32 1, %v1559_v58 }
 0x25d   :  { %165 = vrot.lane.b32.xlu1 %v163_v45, %s1451_s18 }
 0x2cf   :  { %v166_v46 = vpop.permute.xlu1 %165 }
 0x2d0   :  { %v168_v47 = vadd.f32 %v166_v46, %v163_v45 }
 0x2d2   :  { %v169_v48 = vmul.f32 0.001953125, %v168_v47 }
 0x2d4   :  { %v170_v49 = vmul.f32 %v169_v48, %v169_v48 }
 0x2d6   :  { %v172_v50 = vrot.slane %v170_v49, 7 }
 0x2d8   :  { %v174_v51 = vsub.f32 %v169_v48, %v172_v50 }
 0x2da   :  { %v175_v52 = vmax.f32 %v174_v51, 0.0 }
 0x2dc   :  { %v176_v53 = vadd.f32 1e-05, %v175_v52 }
 0x2de   :  { %1440 = vrsqrt.f32 %v176_v53 }
 0x2e8   :  { %v1441_v60 = vpop.eup %1440 }
 0x2e9   :  { %v185_v61 = vrot.slane %v1441_v60, %v1562_v59 }
 0x2eb   :  { %v186_v62 = vcombine.high %v185_v61, %v185_v61 }
 0x2ed   :  { %v193_v0 = vrot.slane %v186_v62, %v1562_v59 }
 0x2ef   :  { %v195_v1 = vmul.f32 %v193_v0, %v1568_v63  ;;  %v1424_v0 = vld [vmem:[%s1870_s2 + $0x80] sm:$0xff]  }
 0x2f1   :  { %v196_v2 = vmul.f32 %v195_v1, %v169_v48 }
 0x2f3   :  { %v204_v3 = vrot.slane %v196_v2, %v1562_v59  ;;  %v1428_v2 = vld [vmem:[%s1870_s2 + $0xa0] sm:$0xff]  }
 0x2f5   :  { %v211_v4 = vrot.slane %v204_v3, %v1562_v59  ;;  %v1429_v3 = vld [vmem:[%s1870_s2 + $0xa8] sm:$0xff]  }
 0x2f7   :  { %212 = vrot.lane.b32.xlu0 %v211_v4, %s1453_s21  ;;  %v1430_v4 = vld [vmem:[%s1870_s2 + $0xb0] sm:$0xff]  }
 0x369   :  { %v213_v6 = vpop.permute.xlu0 %212 }
 0x36a   :  { %v215_v7 = vsub.f32 %v1568_v63, %v213_v6  ;;  %v1431_v6 = vld [vmem:[%s1870_s2 + $0xb8] sm:$0xff]  }
 0x36c   :  { %v220_v10 = vrot.slane %v215_v7, %v1575_v5 }
 0x36e   :  { %221 = vrot.lane.b32.xlu1 %v220_v10, %s1451_s18 }
 0x3e0   :  { %v222_v12 = vpop.permute.xlu1 %221 }
 0x3e1   :  { %v224_v17 = vsel %vm147_vm1, %v195_v1, %v222_v12 }
 0x3e2   :  { %226 = vrot.lane.b32.xlu0 %v224_v17, %s1453_s21 }
 0x454   :  { %v227_v18 = vpop.permute.xlu0 %226 }
 0x455   :  { %v230_v19 = vsel %vm229_vm2, %v224_v17, %v227_v18 }
 0x456   :  { %232 = vrot.lane.b32.xlu1 %v230_v19, %s1454_s5 }
 0x4c8   :  { %v233_v27 = vpop.permute.xlu1 %232 }
 0x4c9   :  { %v236_v29 = vsel %vm235_vm3, %v230_v19, %v233_v27 }
 0x4ca   :  { %238 = vrot.lane.b32.xlu0 %v236_v29, %s1456_s15 }
 0x4ce   :  { %386 = vperm.xlu0 %1402, %v382_v42  }
 0x53c   :  { %v239_v39 = vpop.permute.xlu0 %238 }
 0x53d   :  { %v242_v40 = vsel %vm241_vm5, %v236_v29, %v239_v39 }
 0x53e   :  { %244 = vrot.lane.b32.xlu1 %v242_v40, %s1448_s0 }
 0x542   :  { %391 = vperm.xlu1 %1403, %v383_v43  }
 0x54d   :  { %v387_v23 = vpop.permute.xlu0 %386 }
 0x5b0   :  { %v245_v45 = vpop.permute.xlu1 %244 }
 0x5b1   :  { %v247_v46 = vsel %vm69_vm0, %v242_v40, %v245_v45 }
 0x5b2   :  { %v251_v47 = vrot.slane %v247_v46, %v1575_v5  ;;  %v259_v48 = vrot.slane %v247_v46, %v1664_v44 }
 0x5b4   :  { %v252_v49 = vmul.f32 %v251_v47, %v1536_v14  ;;  %v253_v50 = vmul.f32 %v251_v47, %v1540_v16  ;;  %v254_v51 = vmul.f32 %v1534_v13, %v251_v47  ;;  %v255_v52 = vmul.f32 %v1538_v15, %v251_v47  ;;  %v1425_v13 = vld [vmem:[%s1870_s2 + $0x88] sm:$0xff]   ;;  %v1426_v15 = vld [vmem:[%s1870_s2 + $0x90] sm:$0xff]   ;;  %v1427_v16 = vld [vmem:[%s1870_s2 + $0x98] sm:$0xff]   ;;  %s1459_s2 = smov 24  }
 0x5b6   :  { %v262_v53 = vadd.f32 %v259_v48, %v254_v51  ;;  %v263_v54 = vadd.f32 %v259_v48, %v255_v52  ;;  %v260_v55 = vadd.f32 %v259_v48, %v252_v49  ;;  %v261_v56 = vadd.f32 %v259_v48, %v253_v50 }
 0x5b8   :  { %v266_v57 = vmax.f32 %v262_v53, 0.0  ;;  %v267_v60 = vmax.f32 %v263_v54, 0.0  ;;  %v264_v61 = vmax.f32 %v260_v55, 0.0  ;;  %v265_v62 = vmax.f32 %v261_v56, 0.0 }
 0x5ba   :  { %v269_v1 = vpack.c.bf16 %v267_v60, %v266_v57  ;;  %v268_v14 = vpack.c.bf16 %v265_v62, %v264_v61 }
 0x5bc   :  { %1315 = vmatmul.mubr.bf16.vlgmr.msra.gmra.mrb[0].mxu1 %v269_v1  ;;  %1335 = vmatmul.mubr.bf16.vlgmr.msra.gmra.mrb[4].mxu0 %v268_v14 }
 0x5bd   :  { %1339 = vmatpush3.bf16.msra.mxu0 %v1424_v0  ;;  %1354 = vmatprep.mubr.msk.bf16.mxu0 %vm1457_vm4, %v1455_v20 }
 0x5be   :  { %1340 = vmatprep.subr.bf16.mxu0 %v1455_v20  ;;  %1366 = vmatprep.mubr.msk.bf16.mxu1 %vm1457_vm4, %v1455_v20 }
 0x5c1   :  { %1341 = vmatpush3.bf16.msra.mxu0 %v1425_v13  ;;  %v392_v24 = vpop.permute.xlu1 %391 }
 0x5c2   :  { %1342 = vmatprep.subr.bf16.mxu0 %v1455_v20 }
 0x5c5   :  { %1343 = vmatpush3.bf16.msra.mxu0 %v1426_v15 }
 0x5c6   :  { %1344 = vmatprep.subr.bf16.mxu0 %v1455_v20 }
 0x5c9   :  { %1345 = vmatpush3.bf16.msra.mxu0 %v1427_v16 }
 0x5ca   :  { %1346 = vmatprep.subr.bf16.mxu0 %v1455_v20 }
 0x5cd   :  { %1347 = vmatpush3.bf16.msra.mxu0 %v1428_v2 }
 0x5ce   :  { %1348 = vmatprep.subr.bf16.mxu0 %v1455_v20 }
 0x5d1   :  { %1349 = vmatpush3.bf16.msra.mxu0 %v1429_v3 }
 0x5d2   :  { %1350 = vmatprep.subr.bf16.mxu0 %v1455_v20 }
 0x5d5   :  { %1351 = vmatpush3.bf16.msra.mxu0 %v1430_v4 }
 0x5d6   :  { %1352 = vmatprep.subr.bf16.mxu0 %v1455_v20 }
 0x5d9   :  { %1353 = vmatpush3.bf16.msra.mxu0 %v1431_v6 }
 0x5dc   :  { %1355 = vmatmul.mubr.bf16.vlgmr.msra.gmra.mrb[4].mxu0 %v269_v1 }
 0x68f   :  { %v368_v7 = vpop.f32.mrb[0].mxu1 }
 0x690   :  { %v1316_v10 = vpop.f32.mrb[1].mxu1  ;;  %v375_v17 = vrot.slane %v368_v7, 7 }
 0x691   :  { %v371_v12 = vpop.f32.mrb[2].mxu1 }
 0x692   :  { %v376_v18 = vrot.slane %v371_v12, 7  ;;  %v1317_v19 = vpop.f32.mrb[3].mxu1 }
 0x694   :  { %v380_v21 = vsel %vm379_vm6, %v375_v17, %v376_v18  ;;  %v381_v22 = vsel %vm379_vm6, %v376_v18, %v375_v17 }
 0x695   :  { %v394_v25 = vmul.f32 %v387_v23, %v381_v22  ;;  %v395_v27 = vmul.f32 %v392_v24, %v380_v21 }
 0x6af   :  { %v603_v26 = vpop.f32.mrb[4].mxu0 }
 0x6b0   :  { %v1709_v28 = vadd.f32 %v603_v26, %v394_v25  ;;  %v1356_v29 = vpop.f32.mrb[5].mxu0  ;;  %v1432_v26 = vld [vmem:[%s1872_s3] sm:$0xff]  }
 0x6b1   :  { %v606_v30 = vpop.f32.mrb[6].mxu0  ;;  %1359 = vmatpush3.bf16.msra.mxu1 %v1432_v26 }
 0x6b2   :  { %v621_v31 = vmul.f32 %v1709_v28, %v1709_v28  ;;  %v1713_v32 = vadd.f32 %v606_v30, %v395_v27  ;;  %v1357_v58 = vpop.f32.mrb[7].mxu0  ;;  %v612_v33 = vsel %vm69_vm0, %v1709_v28, 0.0  ;;  %v1433_v27 = vld [vmem:[%s1872_s3 + $0x8] sm:$0xff]   ;;  %1360 = vmatprep.subr.bf16.mxu1 %v1455_v20 }
 0x6b3   :  { %v1434_v58 = vld [vmem:[%s1872_s3 + $0x10] sm:$0xff]  }
 0x6b4   :  { %v613_v34 = vsel %vm69_vm0, %v1713_v32, 0.0  ;;  %v622_v35 = vmul.f32 %v1713_v32, %v1713_v32  ;;  %v623_v37 = vsel %vm69_vm0, %v621_v31, 0.0 }
 0x6b5   :  { %v614_v36 = vadd.f32 %v613_v34, %v612_v33  ;;  %1361 = vmatpush3.bf16.msra.mxu1 %v1433_v27  ;;  %v1435_v33 = vld [vmem:[%s1872_s3 + $0x18] sm:$0xff]  }
 0x6b6   :  { %v624_v38 = vsel %vm69_vm0, %v622_v35, 0.0  ;;  %1362 = vmatprep.subr.bf16.mxu1 %v1455_v20 }
 0x6b7   :  { %v615_v39 = vrot.slane %v614_v36, 4  ;;  %v625_v40 = vadd.f32 %v624_v38, %v623_v37 }
 0x6b9   :  { %v616_v41 = vadd.f32 %v615_v39, %v614_v36  ;;  %v626_v42 = vrot.slane %v625_v40, 4  ;;  %1363 = vmatpush3.bf16.msra.mxu1 %v1434_v58 }
 0x6ba   :  { %1364 = vmatprep.subr.bf16.mxu1 %v1455_v20 }
 0x6bb   :  { %v617_v43 = vrot.slane %v616_v41, 2  ;;  %v627_v45 = vadd.f32 %v626_v42, %v625_v40 }
 0x6bd   :  { %v618_v46 = vadd.f32 %v617_v43, %v616_v41  ;;  %v628_v47 = vrot.slane %v627_v45, 2  ;;  %1365 = vmatpush3.bf16.msra.mxu1 %v1435_v33 }
 0x6be   :  { %1370 = vmatprep.subr.bf16.mxu1 %v1455_v20 }
 0x6bf   :  { %v619_v48 = vrot.slane %v618_v46, 1  ;;  %v629_v49 = vadd.f32 %v628_v47, %v627_v45  ;;  %v1436_v47 = vld [vmem:[%s1873_s4] sm:$0xff]  }
 0x6c1   :  { %v630_v50 = vrot.slane %v629_v49, 1  ;;  %v620_v51 = vadd.f32 %v619_v48, %v618_v46 }
 0x6c3   :  { %v631_v52 = vadd.f32 %v630_v50, %v629_v49  ;;  %v1439_v49 = vld [vmem:[%s1873_s4 + $0x18] sm:$0xff]  }
 0x6c5   :  { %v632_v53 = vsel %vm147_vm1, %v620_v51, %v631_v52 }
 0x6c6   :  { %634 = vrot.lane.b32.xlu1 %v632_v53, %s1449_s1 }
 0x738   :  { %v635_v54 = vpop.permute.xlu1 %634 }
 0x739   :  { %v637_v55 = vadd.f32 %v635_v54, %v632_v53 }
 0x73b   :  { %639 = vrot.lane.b32.xlu0 %v637_v55, %s1450_s17 }
 0x7ad   :  { %v640_v56 = vpop.permute.xlu0 %639 }
 0x7ae   :  { %v642_v57 = vadd.f32 %v640_v56, %v637_v55 }
 0x7b0   :  { %644 = vrot.lane.b32.xlu1 %v642_v57, %s1451_s18 }
 0x822   :  { %v645_v60 = vpop.permute.xlu1 %644 }
 0x823   :  { %v647_v61 = vadd.f32 %v645_v60, %v642_v57 }
 0x825   :  { %v648_v62 = vmul.f32 0.0078125, %v647_v61 }
 0x827   :  { %v649_v0 = vmul.f32 %v648_v62, %v648_v62 }
 0x829   :  { %v651_v1 = vrot.slane %v649_v0, 7 }
 0x82b   :  { %v653_v14 = vsub.f32 %v648_v62, %v651_v1 }
 0x82d   :  { %v654_v13 = vmax.f32 %v653_v14, 0.0 }
 0x82f   :  { %v655_v15 = vadd.f32 1e-05, %v654_v13 }
 0x831   :  { %1442 = vrsqrt.f32 %v655_v15 }
 0x83b   :  { %v1443_v16 = vpop.eup %1442 }
 0x83c   :  { %v664_v2 = vrot.slane %v1443_v16, %v1562_v59 }
 0x83e   :  { %v665_v3 = vcombine.high %v664_v2, %v664_v2 }
 0x840   :  { %v672_v4 = vrot.slane %v665_v3, %v1562_v59 }
 0x842   :  { %673 = vrot.lane.b32.xlu0 %v672_v4, %s1454_s5 }
 0x8b4   :  { %v674_v6 = vpop.permute.xlu0 %673 }
 0x8b5   :  { %v676_v7 = vmul.f32 %v674_v6, %v1568_v63 }
 0x8b7   :  { %v681_v10 = vrot.slane %v676_v7, %v1575_v5 }
 0x8b9   :  { %682 = vrot.lane.b32.xlu1 %v681_v10, %s1450_s17 }
 0x92b   :  { %v683_v12 = vpop.permute.xlu1 %682 }
 0x92c   :  { %v685_v17 = vmul.f32 %v683_v12, %v648_v62 }
 0x92e   :  { %v693_v18 = vrot.slane %v685_v17, %v1562_v59 }
 0x930   :  { %v700_v19 = vrot.slane %v693_v18, %v1562_v59 }
 0x932   :  { %701 = vrot.lane.b32.xlu0 %v700_v19, %s1459_s2 }
 0x9a4   :  { %v702_v21 = vpop.permute.xlu0 %701 }
 0x9a5   :  { %v704_v22 = vsub.f32 %v1568_v63, %v702_v21 }
 0x9a7   :  { %v709_v23 = vrot.slane %v704_v22, %v1575_v5 }
 0x9a9   :  { %710 = vrot.lane.b32.xlu1 %v709_v23, %s1451_s18 }
 0xa1b   :  { %v711_v24 = vpop.permute.xlu1 %710 }
 0xa1c   :  { %v713_v25 = vsel %vm147_vm1, %v676_v7, %v711_v24 }
 0xa1d   :  { %718 = vrot.lane.b32.xlu1 %v713_v25, %s1451_s18  ;;  %715 = vrot.lane.b32.xlu0 %v713_v25, %s1450_s17 }
 0xa8f   :  { %v719_v29 = vpop.permute.xlu1 %718  ;;  %v716_v30 = vpop.permute.xlu0 %715 }
 0xa90   :  { %v721_v31 = vsel %vm229_vm2, %v716_v30, %v719_v29 }
 0xa91   :  { %723 = vrot.lane.b32.xlu0 %v721_v31, %s1454_s5 }
 0xb03   :  { %v724_v34 = vpop.permute.xlu0 %723 }
 0xb04   :  { %v726_v35 = vsel %vm235_vm3, %v721_v31, %v724_v34 }
 0xb05   :  { %728 = vrot.lane.b32.xlu1 %v726_v35, %s1456_s15 }
 0xb77   :  { %v729_v36 = vpop.permute.xlu1 %728 }
 0xb78   :  { %v731_v37 = vsel %vm241_vm5, %v726_v35, %v729_v36 }
 0xb79   :  { %v735_v38 = vrot.slane %v731_v37, %v1575_v5  ;;  %v741_v41 = vrot.slane %v731_v37, %v1664_v44 }
 0xb7b   :  { %v736_v39 = vmul.f32 %v1709_v28, %v735_v38  ;;  %v737_v40 = vmul.f32 %v1713_v32, %v735_v38  ;;  %v1437_v28 = vld [vmem:[%s1873_s4 + $0x8] sm:$0xff]   ;;  %v1438_v32 = vld [vmem:[%s1873_s4 + $0x10] sm:$0xff]   ;;  %s1460_s4 = smov 48  }
 0xb7d   :  { %v742_v42 = vadd.f32 %v741_v41, %v736_v39  ;;  %v743_v43 = vadd.f32 %v741_v41, %v737_v40 }
 0xb7f   :  { %v744_v45 = vmax.f32 %v742_v42, 0.0  ;;  %v745_v46 = vmax.f32 %v743_v43, 0.0 }
 0xb81   :  { %v746_v48 = vpack.c.bf16 %v745_v46, %v744_v45 }
 0xb83   :  { %1367 = vmatmul.mubr.msk.bf16.vlgmr.msra.gmra.mrb[4].mxu1 %vm69_vm0, %v746_v48 }
 0xb84   :  { %1371 = vmatpush3.bf16.msra.mxu1 %v1436_v47  ;;  %1378 = vmatprep.mubr.msk.bf16.mxu1 %vm1457_vm4, %v1455_v20 }
 0xb85   :  { %1372 = vmatprep.subr.bf16.mxu1 %v1455_v20 }
 0xb88   :  { %1373 = vmatpush3.bf16.msra.mxu1 %v1437_v28 }
 0xb89   :  { %1374 = vmatprep.subr.bf16.mxu1 %v1455_v20 }
 0xb8c   :  { %1375 = vmatpush3.bf16.msra.mxu1 %v1438_v32 }
 0xb8d   :  { %1376 = vmatprep.subr.bf16.mxu1 %v1455_v20 }
 0xb90   :  { %1377 = vmatpush3.bf16.msra.mxu1 %v1439_v49 }
 0xb93   :  { %1379 = vmatmul.mubr.msk.bf16.vlgmr.msra.gmra.mrb[8].mxu1 %vm69_vm0, %v953_v11 }
 0xc56   :  { %v1788_v50 = vpop.f32.mrb[4].mxu1 }
 0xc57   :  { %v1368_v51 = vpop.f32.mrb[5].mxu1  ;;  %v830_v53 = vmul.f32 %v1788_v50, %v1788_v50 }
 0xc58   :  { %v1790_v52 = vpop.f32.mrb[6].mxu1 }
 0xc59   :  { %v823_v54 = vadd.f32 %v1790_v52, %v1788_v50  ;;  %v831_v20 = vmul.f32 %v1790_v52, %v1790_v52  ;;  %v1369_v55 = vpop.f32.mrb[7].mxu1 }
 0xc5b   :  { %v824_v56 = vrot.slane %v823_v54, 4  ;;  %v832_v57 = vadd.f32 %v831_v20, %v830_v53 }
 0xc5d   :  { %v825_v8 = vadd.f32 %v824_v56, %v823_v54  ;;  %v833_v9 = vrot.slane %v832_v57, 4 }
 0xc5f   :  { %v826_v11 = vrot.slane %v825_v8, 2  ;;  %v834_v60 = vadd.f32 %v833_v9, %v832_v57 }
 0xc61   :  { %v827_v61 = vadd.f32 %v826_v11, %v825_v8  ;;  %v835_v62 = vrot.slane %v834_v60, 2 }
 0xc63   :  { %v828_v0 = vrot.slane %v827_v61, 1  ;;  %v836_v1 = vadd.f32 %v835_v62, %v834_v60 }
 0xc65   :  { %v837_v14 = vrot.slane %v836_v1, 1  ;;  %v829_v16 = vadd.f32 %v828_v0, %v827_v61 }
 0xc66   :  { %v1798_v13 = vpop.f32.mrb[8].mxu1 }
 0xc67   :  { %v1380_v15 = vpop.f32.mrb[9].mxu1  ;;  %v838_v2 = vadd.f32 %v837_v14, %v836_v1  ;;  %v1037_v4 = vmul.f32 %v1798_v13, %v1798_v13 }
 0xc68   :  { %v1800_v3 = vpop.f32.mrb[10].mxu1 }
 0xc69   :  { %v1030_v6 = vadd.f32 %v1800_v3, %v1798_v13  ;;  %v1038_v7 = vmul.f32 %v1800_v3, %v1800_v3  ;;  %v1381_v10 = vpop.f32.mrb[11].mxu1  ;;  %v839_v12 = vsel %vm147_vm1, %v829_v16, %v838_v2 }
 0xc6a   :  { %841 = vrot.lane.b32.xlu0 %v839_v12, %s1448_s0 }
 0xc6b   :  { %v1031_v17 = vrot.slane %v1030_v6, 4  ;;  %v1039_v18 = vadd.f32 %v1038_v7, %v1037_v4 }
 0xc6d   :  { %v1032_v19 = vadd.f32 %v1031_v17, %v1030_v6  ;;  %v1040_v21 = vrot.slane %v1039_v18, 4 }
 0xc6f   :  { %v1033_v22 = vrot.slane %v1032_v19, 2  ;;  %v1041_v23 = vadd.f32 %v1040_v21, %v1039_v18 }
 0xc71   :  { %v1034_v24 = vadd.f32 %v1033_v22, %v1032_v19  ;;  %v1042_v25 = vrot.slane %v1041_v23, 2 }
 0xc73   :  { %v1035_v26 = vrot.slane %v1034_v24, 1  ;;  %v1043_v27 = vadd.f32 %v1042_v25, %v1041_v23 }
 0xc75   :  { %v1044_v29 = vrot.slane %v1043_v27, 1  ;;  %v1036_v30 = vadd.f32 %v1035_v26, %v1034_v24 }
 0xc77   :  { %v1045_v31 = vadd.f32 %v1044_v29, %v1043_v27 }
 0xc79   :  { %v1046_v58 = vsel %vm147_vm1, %v1036_v30, %v1045_v31 }
 0xc7a   :  { %1048 = vrot.lane.b32.xlu1 %v1046_v58, %s1448_s0 }
 0xcdc   :  { %v842_v33 = vpop.permute.xlu0 %841 }
 0xcdd   :  { %v844_v34 = vadd.f32 %v842_v33, %v839_v12 }
 0xcdf   :  { %846 = vrot.lane.b32.xlu0 %v844_v34, %s1449_s1 }
 0xcec   :  { %v1049_v35 = vpop.permute.xlu1 %1048 }
 0xced   :  { %v1051_v36 = vadd.f32 %v1049_v35, %v1046_v58 }
 0xcef   :  { %1053 = vrot.lane.b32.xlu1 %v1051_v36, %s1449_s1 }
 0xd51   :  { %v847_v37 = vpop.permute.xlu0 %846 }
 0xd52   :  { %v849_v38 = vadd.f32 %v847_v37, %v844_v34 }
 0xd54   :  { %851 = vrot.lane.b32.xlu0 %v849_v38, %s1450_s17 }
 0xd61   :  { %v1054_v39 = vpop.permute.xlu1 %1053 }
 0xd62   :  { %v1056_v40 = vadd.f32 %v1054_v39, %v1051_v36 }
 0xd64   :  { %1058 = vrot.lane.b32.xlu1 %v1056_v40, %s1450_s17 }
 0xdc6   :  { %v852_v41 = vpop.permute.xlu0 %851 }
 0xdc7   :  { %v854_v42 = vadd.f32 %v852_v41, %v849_v38 }
 0xdc9   :  { %v855_v43 = vmul.f32 0.0078125, %v854_v42 }
 0xdcb   :  { %v856_v45 = vmul.f32 %v855_v43, %v855_v43 }
 0xdcd   :  { %v858_v46 = vrot.slane %v856_v45, 7 }
 0xdcf   :  { %v860_v47 = vsub.f32 %v855_v43, %v858_v46 }
 0xdd1   :  { %v861_v48 = vmax.f32 %v860_v47, 0.0 }
 0xdd3   :  { %v862_v28 = vadd.f32 1e-05, %v861_v48 }
 0xdd5   :  { %1444 = vrsqrt.f32 %v862_v28 }
 0xdd6   :  { %v1059_v32 = vpop.permute.xlu1 %1058 }
 0xdd7   :  { %v1061_v49 = vadd.f32 %v1059_v32, %v1056_v40 }
 0xdd9   :  { %v1062_v51 = vmul.f32 0.0078125, %v1061_v49 }
 0xddb   :  { %v1063_v53 = vmul.f32 %v1062_v51, %v1062_v51 }
 0xddd   :  { %v1065_v54 = vrot.slane %v1063_v53, 7 }
 0xddf   :  { %v1445_v20 = vpop.eup %1444  ;;  %v1067_v55 = vsub.f32 %v1062_v51, %v1065_v54 }
 0xde0   :  { %v871_v56 = vrot.slane %v1445_v20, %v1562_v59 }
 0xde1   :  { %v1068_v57 = vmax.f32 %v1067_v55, 0.0 }
 0xde2   :  { %v872_v8 = vcombine.high %v871_v56, %v871_v56 }
 0xde3   :  { %v1069_v9 = vadd.f32 1e-05, %v1068_v57 }
 0xde4   :  { %v879_v11 = vrot.slane %v872_v8, %v1562_v59 }
 0xde5   :  { %1446 = vrsqrt.f32 %v1069_v9 }
 0xde6   :  { %880 = vrot.lane.b32.xlu0 %v879_v11, %s1456_s15 }
 0xdef   :  { %v1447_v60 = vpop.eup %1446 }
 0xdf0   :  { %v1078_v61 = vrot.slane %v1447_v60, %v1562_v59 }
 0xdf2   :  { %v1079_v62 = vcombine.high %v1078_v61, %v1078_v61 }
 0xdf4   :  { %v1086_v0 = vrot.slane %v1079_v62, %v1562_v59 }
 0xdf6   :  { %1087 = vrot.lane.b32.xlu1 %v1086_v0, %s1448_s0 }
 0xe58   :  { %v881_v1 = vpop.permute.xlu0 %880 }
 0xe59   :  { %v883_v14 = vmul.f32 %v881_v1, %v1568_v63 }
 0xe5b   :  { %v888_v15 = vrot.slane %v883_v14, %v1575_v5 }
 0xe5d   :  { %889 = vrot.lane.b32.xlu0 %v888_v15, %s1449_s1 }
 0xe68   :  { %v1088_v16 = vpop.permute.xlu1 %1087 }
 0xe69   :  { %v1090_v2 = vmul.f32 %v1088_v16, %v1568_v63 }
 0xe6b   :  { %v1095_v4 = vrot.slane %v1090_v2, %v1575_v5 }
 0xe6d   :  { %1096 = vrot.lane.b32.xlu1 %v1095_v4, %s1448_s0 }
 0xecf   :  { %v890_v6 = vpop.permute.xlu0 %889 }
 0xed0   :  { %v892_v7 = vmul.f32 %v890_v6, %v855_v43 }
 0xed2   :  { %v900_v10 = vrot.slane %v892_v7, %v1562_v59 }
 0xed4   :  { %v907_v12 = vrot.slane %v900_v10, %v1562_v59 }
 0xed6   :  { %908 = vrot.lane.b32.xlu0 %v907_v12, %s1460_s4 }
 0xedf   :  { %v1097_v17 = vpop.permute.xlu1 %1096 }
 0xee0   :  { %v1099_v18 = vmul.f32 %v1097_v17, %v1062_v51 }
 0xee2   :  { %v1107_v19 = vrot.slane %v1099_v18, %v1562_v59 }
 0xee4   :  { %v1114_v21 = vrot.slane %v1107_v19, %v1562_v59 }
 0xee6   :  { %1115 = vrot.lane.b32.xlu1 %v1114_v21, %s1461_s25 }
 0xf48   :  { %v909_v22 = vpop.permute.xlu0 %908 }
 0xf49   :  { %v911_v23 = vsub.f32 %v1568_v63, %v909_v22 }
 0xf4b   :  { %v916_v24 = vrot.slane %v911_v23, %v1575_v5 }
 0xf4d   :  { %917 = vrot.lane.b32.xlu0 %v916_v24, %s1450_s17 }
 0xf58   :  { %v1116_v25 = vpop.permute.xlu1 %1115 }
 0xf59   :  { %v1118_v26 = vsub.f32 %v1568_v63, %v1116_v25 }
 0xf5b   :  { %v1123_v27 = vrot.slane %v1118_v26, %v1575_v5 }
 0xf5d   :  { %1124 = vrot.lane.b32.xlu1 %v1123_v27, %s1450_s17 }
 0xfbf   :  { %v918_v29 = vpop.permute.xlu0 %917 }
 0xfc0   :  { %v920_v30 = vsel %vm147_vm1, %v883_v14, %v918_v29 }
 0xfc1   :  { %922 = vrot.lane.b32.xlu0 %v920_v30, %s1449_s1  ;;  %925 = vrot.lane.b32.xlu1 %v920_v30, %s1450_s17 }
 0xfcf   :  { %v1125_v59 = vpop.permute.xlu1 %1124 }
 0xfd0   :  { %v1127_v31 = vsel %vm147_vm1, %v1090_v2, %v1125_v59 }
 0xfd1   :  { %1132 = vrot.lane.b32.xlu1 %v1127_v31, %s1461_s25  ;;  %1129 = vrot.lane.b32.xlu0 %v1127_v31, %s1448_s0 }
0x1033   :  { %v923_v58 = vpop.permute.xlu0 %922  ;;  %v926_v33 = vpop.permute.xlu1 %925 }
0x1034   :  { %v928_v63 = vsel %vm235_vm3, %v923_v58, %v926_v33 }
0x1035   :  { %930 = vrot.lane.b32.xlu0 %v928_v63, %s1456_s15 }
0x1043   :  { %v1130_v34 = vpop.permute.xlu0 %1129  ;;  %v1133_v35 = vpop.permute.xlu1 %1132 }
0x1044   :  { %v1135_v36 = vsel %vm235_vm3, %v1130_v34, %v1133_v35 }
0x1045   :  { %1137 = vrot.lane.b32.xlu1 %v1135_v36, %s1456_s15 }
0x10a7   :  { %v931_v37 = vpop.permute.xlu0 %930 }
0x10a8   :  { %v933_v38 = vsel %vm241_vm5, %v928_v63, %v931_v37 }
0x10a9   :  { %935 = vrot.lane.b32.xlu0 %v933_v38, %s1448_s0 }
0x10b7   :  { %v1138_v39 = vpop.permute.xlu1 %1137 }
0x10b8   :  { %v1140_v40 = vsel %vm241_vm5, %v1135_v36, %v1138_v39 }
0x10b9   :  { %1142 = vrot.lane.b32.xlu1 %v1140_v40, %s1448_s0 }
0x111b   :  { %v936_v41 = vpop.permute.xlu0 %935 }
0x111c   :  { %v938_v42 = vsel %vm69_vm0, %v933_v38, %v936_v41 }
0x111d   :  { %v942_v43 = vrot.slane %v938_v42, %v1575_v5  ;;  %v948_v32 = vrot.slane %v938_v42, %v1664_v44 }
0x111f   :  { %v943_v47 = vmul.f32 %v942_v43, %v1788_v50  ;;  %v944_v48 = vmul.f32 %v942_v43, %v1790_v52 }
0x1121   :  { %v949_v54 = vadd.f32 %v948_v32, %v943_v47  ;;  %v950_v20 = vadd.f32 %v948_v32, %v944_v48 }
0x112b   :  { %v1143_v45 = vpop.permute.xlu1 %1142 }
0x112c   :  { %v1145_v46 = vsel %vm69_vm0, %v1140_v40, %v1143_v45 }
0x112d   :  { %v1149_v28 = vrot.slane %v1145_v46, %v1575_v5  ;;  %v1155_v53 = vrot.slane %v1145_v46, %v1664_v44 }
0x112f   :  { %v1150_v49 = vmul.f32 %v1149_v28, %v1798_v13  ;;  %v1151_v51 = vmul.f32 %v1149_v28, %v1800_v3 }
0x1131   :  { %v1156_v55 = vadd.f32 %v1155_v53, %v1150_v49  ;;  %v1157_v56 = vadd.f32 %v1155_v53, %v1151_v51 }
0x1133   :  { %v1158_v57 = vadd.f32 %v1156_v55, %v949_v54  ;;  %v1159_v8 = vadd.f32 %v1157_v56, %v950_v20 }
0x1135   :  { %v1160_v9 = vmax.f32 %v1158_v57, 0.0  ;;  %v1161_v50 = vmax.f32 %v1159_v8, 0.0 }
0x1137   :  { %1162 = vst [vmem:[%s1874_s7] sm:$0xff] %v1160_v9  ;;  %1163 = vst [vmem:[%s1874_s7 + $0x8] sm:$0xff] %v1161_v50 }

</bundles_post_ra>
